<compile_context>
chip_gen: v7x
topology: tpu7x:2x2x1
jax: 0.10.0
libtpu: 0.0.40
codegen_flags: <defaults>
</compile_context>

<pallas_src>
import jax
import jax.numpy as jnp
from jax.experimental import pallas as pl
from jax.experimental.pallas import tpu as pltpu


def _mvnet_kernel(imgs_ref, w_enc_ref, b_enc_ref, w_hd_ref, b_hd_ref,
                  out_ref, acc_ref):
    """One K-tile of the fused multi-view encoder + selected-branch head.

    imgs_ref : [n_k, B, tk] bf16  resident flattened view pixels (all K tiles)
    w_enc_ref: [tk, Hid]    bf16  fused per-view encoder weights (streamed K tile)
    b_enc_ref: [1, Hid]     f32   encoder bias (resident)
    w_hd_ref : [Hid, O]     bf16  selected-branch head weights (resident)
    b_hd_ref : [1, O]       f32   selected-branch head bias (resident)
    out_ref  : [B, O]       f32   sigmoid(branch logits) (resident)
    acc_ref  : [B, Hid]     f32   VMEM scratch accumulator
    """
    k = pl.program_id(0)

    @pl.when(k == 0)
    def _():
        acc_ref[...] = jnp.zeros_like(acc_ref)

    # One long-K MXU matmul slice; bf16 x bf16 operands, f32 accumulation.
    acc_ref[...] += jnp.dot(imgs_ref[k], w_enc_ref[...],
                            preferred_element_type=jnp.float32)

    @pl.when(k == pl.num_programs(0) - 1)
    def _():
        feat = jnp.maximum(acc_ref[...] + b_enc_ref[...], 0.0)
        # Tiny epilogue: exact f32 head matmul + exact sigmoid.
        logits = jnp.dot(feat, w_hd_ref[...].astype(jnp.float32),
                         preferred_element_type=jnp.float32) + b_hd_ref[...]
        out_ref[...] = 1.0 / (1.0 + jnp.exp(-logits))


def _choose_k_tiling(K, batch, hidden, out_dim, *, align=256, max_tk=8192):
    """Pick the K tile.

    Generation-aware VMEM budget; tk is the largest `align`-multiple that fits
    (no divisibility constraint on K -- K is padded up to a multiple of tk).
    Returns (k_pad, tk, vmem_limit_bytes).
    """
    try:
        info = pltpu.get_tpu_info()
        phys = int(getattr(info, "vmem_capacity_bytes", 64 * 1024 * 1024))
    except Exception:
        phys = 64 * 1024 * 1024                      # v7x-safe fallback
    vmem_limit = (phys * 3) // 4                     # ~96 MiB v5e/v6e, ~48 MiB v7x
    budget = vmem_limit - 8 * 1024 * 1024            # headroom for compiler scratch

    k_rounded = pl.cdiv(K, align) * align

    # Resident bytes (conservatively counted with pipelining buffer factor 2):
    resident = (2 * batch * (k_rounded + max_tk) * 2          # images (bf16)
                + batch * hidden * 4                          # f32 accumulator
                + 2 * (hidden * 4 + hidden * out_dim * 2 + out_dim * 4)
                + 2 * batch * out_dim * 4)
    stream_budget = max(budget - resident, 4 * align * hidden)

    # Double-buffered bf16 weight tile: 2 * tk * hidden * 2 bytes.
    tk_cap = stream_budget // (2 * 2 * hidden)
    tk_cap = max(align, (tk_cap // align) * align)
    tk_cap = min(tk_cap, max_tk)

    if k_rounded <= tk_cap:
        tk = k_rounded                               # single-shot path, grid=(1,)
    else:
        tk = tk_cap
    k_pad = pl.cdiv(K, tk) * tk
    return k_pad, tk, vmem_limit


def _run_fused_model(imgs_flat, w_enc_flat, b_enc, w_hd, b_hd):
    """imgs_flat: [B, K] bf16, w_enc_flat: [K, Hid] bf16 -> [B, O] f32."""
    B, K = imgs_flat.shape
    hid = w_enc_flat.shape[1]
    out_dim = w_hd.shape[1]

    k_pad, tk, vmem_limit = _choose_k_tiling(K, B, hid, out_dim)
    if k_pad != K:  # zero-pad the contraction axis (exact, contributes nothing)
        imgs_flat = jnp.pad(imgs_flat, ((0, 0), (0, k_pad - K)))
        w_enc_flat = jnp.pad(w_enc_flat, ((0, k_pad - K), (0, 0)))

    n_k = k_pad // tk
    # Resident image layout [n_k, B, tk]; the kernel indexes the leading axis.
    imgs_tiles = imgs_flat.reshape(B, n_k, tk).transpose(1, 0, 2)

    return pl.pallas_call(
        _mvnet_kernel,
        out_shape=jax.ShapeDtypeStruct((B, out_dim), jnp.float32),
        grid_spec=pltpu.PrefetchScalarGridSpec(
            num_scalar_prefetch=0,
            grid=(n_k,),
            in_specs=[
                pl.BlockSpec((n_k, B, tk), lambda k: (0, 0, 0)),  # resident images
                pl.BlockSpec((tk, hid), lambda k: (k, 0)),        # streamed weights
                pl.BlockSpec((1, hid), lambda k: (0, 0)),         # resident bias
                pl.BlockSpec((hid, out_dim), lambda k: (0, 0)),   # resident head W
                pl.BlockSpec((1, out_dim), lambda k: (0, 0)),     # resident head b
            ],
            out_specs=pl.BlockSpec((B, out_dim), lambda k: (0, 0)),
            scratch_shapes=[pltpu.VMEM((B, hid), jnp.float32)],
        ),
        compiler_params=pltpu.CompilerParams(
            dimension_semantics=("arbitrary",),       # K is a reduction axis
            vmem_limit_bytes=int(vmem_limit),         # generation-aware cap
        ),
    )(imgs_tiles, w_enc_flat, b_enc, w_hd, b_hd)


def model_wrapper_forward(input_img, stored_inputs, params,
                          branch=0, img_indx=0, slice_indx=0):
    """JAX/Pallas equivalent of ModelWrapper.forward.

    input_img:     [B, 1, H, W]   the perturbed channel/slice
    stored_inputs: list of [B, C, H, W] view images (self.input)
    branch / img_indx / slice_indx must be static Python ints.
    """
    w_enc, b_enc, w_br, b_br = params

    # --- splice input_img into channel `slice_indx` of view `img_indx`
    #     (mirrors torch.cat along dim=1) -- pure data-movement glue.
    x = stored_inputs[img_indx]
    x = jnp.concatenate([x[:, :slice_indx], input_img, x[:, slice_indx + 1:]],
                        axis=1)
    images = (list(stored_inputs[:img_indx]) + [x]
              + list(stored_inputs[img_indx + 1:]))

    # --- stack views + flatten; views become an extended contraction axis so
    #     all per-view encoders fuse into one long-K matmul.  Cast to bf16
    #     BEFORE the layout transpose so the XLA-side copy is half the bytes.
    imgs = jnp.stack(images).astype(jnp.bfloat16)         # [n_views, B, C, H, W]
    n_views, B, C, H, W = imgs.shape
    D = C * H * W
    imgs_flat = (imgs.reshape(n_views, B, D)
                     .transpose(1, 0, 2)
                     .reshape(B, n_views * D))            # [B, K] bf16

    w_enc_flat = w_enc.reshape(n_views * D, -1).astype(jnp.bfloat16)  # [K, Hid]
    b_enc = b_enc.astype(jnp.float32)

    # Only the requested branch head is computed in-kernel.
    w_hd = w_br[branch].astype(jnp.bfloat16)              # [Hid, O]
    b_hd = b_br[branch].astype(jnp.float32)               # [1, O]

    return _run_fused_model(imgs_flat, w_enc_flat, b_enc, w_hd, b_hd)


def _reference_forward(input_img, stored_inputs, params,
                       branch=0, img_indx=0, slice_indx=0):
    """Pure-JAX reference with the same bf16 data path (for correctness check)."""
    w_enc, b_enc, w_br, b_br = params
    x = stored_inputs[img_indx]
    x = jnp.concatenate([x[:, :slice_indx], input_img, x[:, slice_indx + 1:]],
                        axis=1)
    images = (list(stored_inputs[:img_indx]) + [x]
              + list(stored_inputs[img_indx + 1:]))
    imgs = jnp.stack(images).astype(jnp.bfloat16)
    n_views, B, C, H, W = imgs.shape
    D = C * H * W
    imgs_flat = imgs.reshape(n_views, B, D)
    feat = sum(jnp.dot(imgs_flat[v].astype(jnp.float32),
                       w_enc[v].astype(jnp.float32))
               for v in range(n_views))
    feat = jnp.maximum(feat + b_enc.astype(jnp.float32), 0.0)
    logits = (jnp.dot(feat, w_br[branch].astype(jnp.float32))
              + b_br[branch].astype(jnp.float32))
    return jax.nn.sigmoid(logits)


def make_params(n_views, C, H, W, hidden, n_branches, out_dim, key):
    D = C * H * W
    k1, k2, k3, k4 = jax.random.split(key, 4)
    # Weights stored in bf16 (halves HBM traffic); biases in f32.
    w_enc = (jax.random.normal(k1, (n_views, D, hidden), jnp.float32)
             * 0.02).astype(jnp.bfloat16)
    b_enc = jax.random.normal(k2, (1, hidden), jnp.float32) * 0.02
    w_br = (jax.random.normal(k3, (n_branches, hidden, out_dim), jnp.float32)
            * 0.1).astype(jnp.bfloat16)
    b_br = jax.random.normal(k4, (n_branches, 1, out_dim), jnp.float32) * 0.1
    return (w_enc, b_enc, w_br, b_br)


if __name__ == "__main__":
    # Small shapes: 3 views, batch=2, channels=4, spatial=16x16
    n_views, B, C, H, W = 3, 2, 4, 16, 16
    hidden, n_branches, out_dim = 128, 2, 8
    branch, img_indx, slice_indx = 0, 0, 1

    key = jax.random.PRNGKey(0)
    k_in, k_img, k_par = jax.random.split(key, 3)

    stored_inputs = [
        jax.random.normal(k, (B, C, H, W), jnp.float32)
        for k in jax.random.split(k_in, n_views)
    ]
    input_img = jax.random.normal(k_img, (B, 1, H, W), jnp.float32)
    params = make_params(n_views, C, H, W, hidden, n_branches, out_dim, k_par)

    out = model_wrapper_forward(input_img, stored_inputs, params,
                                branch=branch, img_indx=img_indx,
                                slice_indx=slice_indx)
    jax.block_until_ready(out)
    assert out.shape == (B, out_dim)

    ref = _reference_forward(input_img, stored_inputs, params,
                             branch=branch, img_indx=img_indx,
                             slice_indx=slice_indx)
    assert bool(jnp.allclose(out, ref, atol=2e-2, rtol=2e-2))
    print("KERNEL_OK")
</pallas_src>

<mosaic_0001>
module attributes {stable_mosaic.version = 11 : i64} {
  func.func @_mvnet_kernel(%arg0: i32, %arg1: memref<1x2x3072xbf16, #tpu.memory_space<vmem>>, %arg2: memref<3072x128xbf16, #tpu.memory_space<vmem>>, %arg3: memref<1x128xf32, #tpu.memory_space<vmem>>, %arg4: memref<128x8xbf16, #tpu.memory_space<vmem>>, %arg5: memref<1x8xf32, #tpu.memory_space<vmem>>, %arg6: memref<2x8xf32, #tpu.memory_space<vmem>>, %arg7: memref<2x128xf32, #tpu.memory_space<vmem>>) attributes {dimension_semantics = [#tpu.dimension_semantics<arbitrary>], iteration_bounds = array<i64: 1>, scalar_prefetch = 0 : i64, scratch_operands = 1 : i64, tpu.core_type = #tpu.core_type<tc>, window_params = [{pipeline_mode = #tpu.pipeline_mode<synchronous>, transform_indices = @transform_0, window_bounds = array<i64: 1, 2, 3072>}, {transform_indices = @transform_1, window_bounds = array<i64: 3072, 128>}, {pipeline_mode = #tpu.pipeline_mode<synchronous>, transform_indices = @transform_2, window_bounds = array<i64: 1, 128>}, {pipeline_mode = #tpu.pipeline_mode<synchronous>, transform_indices = @transform_3, window_bounds = array<i64: 128, 8>}, {pipeline_mode = #tpu.pipeline_mode<synchronous>, transform_indices = @transform_4, window_bounds = array<i64: 1, 8>}, {pipeline_mode = #tpu.pipeline_mode<synchronous>, transform_indices = @transform_5, window_bounds = array<i64: 2, 8>}]} {
    %c0_i32 = arith.constant 0 : i32
    %0 = arith.cmpi eq, %arg0, %c0_i32 : i32
    %1 = arith.extui %0 : i1 to i32
    %c0_i32_0 = arith.constant 0 : i32
    %2 = arith.cmpi ne, %1, %c0_i32_0 : i32
    scf.if %2 {
      %cst_10 = arith.constant 0.000000e+00 : f32
      %14 = vector.broadcast %cst_10 : f32 to vector<2x128xf32>
      %c0_11 = arith.constant 0 : index
      %c0_12 = arith.constant 0 : index
      %15 = vector.load %arg7[%c0_11, %c0_12] : memref<2x128xf32, #tpu.memory_space<vmem>>, vector<2x128xf32>
      tpu.vector_store %arg7[%c0_11, %c0_12], %14 {strides = array<i32>} : memref<2x128xf32, #tpu.memory_space<vmem>>, vector<2x128xf32>,
    } else {
    }
    %c0 = arith.constant 0 : index
    %c0_1 = arith.constant 0 : index
    %3 = vector.load %arg7[%c0, %c0_1] : memref<2x128xf32, #tpu.memory_space<vmem>>, vector<2x128xf32>
    %4 = arith.index_cast %arg0 : i32 to index
    %c0_2 = arith.constant 0 : index
    %c0_3 = arith.constant 0 : index
    %5 = vector.load %arg1[%4, %c0_2, %c0_3] : memref<1x2x3072xbf16, #tpu.memory_space<vmem>>, vector<1x2x3072xbf16>
    %6 = vector.shape_cast %5 : vector<1x2x3072xbf16> to vector<2x3072xbf16>
    %c0_4 = arith.constant 0 : index
    %c0_5 = arith.constant 0 : index
    %7 = vector.load %arg2[%c0_4, %c0_5] : memref<3072x128xbf16, #tpu.memory_space<vmem>>, vector<3072x128xbf16>
    %cst = arith.constant dense<0.000000e+00> : vector<2x128xf32>
    %8 = tpu.matmul %6, %7, %cst {dimension_numbers = #tpu.dot_dimension_numbers<[1], [0], [0], [1], [0, 0, 1, 1], [], []>} : vector<2x3072xbf16>, vector<3072x128xbf16>, vector<2x128xf32> -> vector<2x128xf32>
    %9 = arith.addf %3, %8 : vector<2x128xf32>
    %c0_6 = arith.constant 0 : index
    %c0_7 = arith.constant 0 : index
    %10 = vector.load %arg7[%c0_6, %c0_7] : memref<2x128xf32, #tpu.memory_space<vmem>>, vector<2x128xf32>
    tpu.vector_store %arg7[%c0_6, %c0_7], %9 {strides = array<i32>} : memref<2x128xf32, #tpu.memory_space<vmem>>, vector<2x128xf32>,
    %c0_i32_8 = arith.constant 0 : i32
    %11 = arith.cmpi eq, %arg0, %c0_i32_8 : i32
    %12 = arith.extui %11 : i1 to i32
    %c0_i32_9 = arith.constant 0 : i32
    %13 = arith.cmpi ne, %12, %c0_i32_9 : i32
    scf.if %13 {
      %c0_10 = arith.constant 0 : index
      %c0_11 = arith.constant 0 : index
      %14 = vector.load %arg7[%c0_10, %c0_11] : memref<2x128xf32, #tpu.memory_space<vmem>>, vector<2x128xf32>
      %c0_12 = arith.constant 0 : index
      %c0_13 = arith.constant 0 : index
      %15 = vector.load %arg3[%c0_12, %c0_13] : memref<1x128xf32, #tpu.memory_space<vmem>>, vector<1x128xf32>
      %16 = vector.broadcast %15 : vector<1x128xf32> to vector<2x128xf32>
      %17 = arith.addf %14, %16 : vector<2x128xf32>
      %cst_14 = arith.constant 0.000000e+00 : f32
      %18 = vector.broadcast %cst_14 : f32 to vector<2x128xf32>
      %19 = arith.maximumf %17, %18 : vector<2x128xf32>
      %c0_15 = arith.constant 0 : index
      %c0_16 = arith.constant 0 : index
      %20 = vector.load %arg4[%c0_15, %c0_16] : memref<128x8xbf16, #tpu.memory_space<vmem>>, vector<128x8xbf16>
      %21 = arith.extf %20 : vector<128x8xbf16> to vector<128x8xf32>
      %cst_17 = arith.constant dense<0.000000e+00> : vector<2x8xf32>
      %22 = tpu.matmul %19, %21, %cst_17 {dimension_numbers = #tpu.dot_dimension_numbers<[1], [0], [0], [1], [0, 0, 1, 1], [], []>} : vector<2x128xf32>, vector<128x8xf32>, vector<2x8xf32> -> vector<2x8xf32>
      %c0_18 = arith.constant 0 : index
      %c0_19 = arith.constant 0 : index
      %23 = vector.load %arg5[%c0_18, %c0_19] : memref<1x8xf32, #tpu.memory_space<vmem>>, vector<1x8xf32>
      %24 = vector.broadcast %23 : vector<1x8xf32> to vector<2x8xf32>
      %25 = arith.addf %22, %24 : vector<2x8xf32>
      %cst_20 = arith.constant 0.000000e+00 : f32
      %26 = vector.broadcast %cst_20 : f32 to vector<2x8xf32>
      %27 = arith.subf %26, %25 : vector<2x8xf32>
      %28 = math.exp %27 : vector<2x8xf32>
      %cst_21 = arith.constant 1.000000e+00 : f32
      %29 = vector.broadcast %cst_21 : f32 to vector<2x8xf32>
      %30 = arith.addf %29, %28 : vector<2x8xf32>
      %cst_22 = arith.constant 1.000000e+00 : f32
      %31 = vector.broadcast %cst_22 : f32 to vector<2x8xf32>
      %32 = arith.divf %31, %30 : vector<2x8xf32>
      %c0_23 = arith.constant 0 : index
      %c0_24 = arith.constant 0 : index
      %33 = vector.load %arg6[%c0_23, %c0_24] : memref<2x8xf32, #tpu.memory_space<vmem>>, vector<2x8xf32>
      tpu.vector_store %arg6[%c0_23, %c0_24], %32 {strides = array<i32>} : memref<2x8xf32, #tpu.memory_space<vmem>>, vector<2x8xf32>,
    } else {
    }
    return
  }
  func.func @transform_0(%arg0: i32) -> (i32, i32, i32) {
    %c0_i32 = arith.constant 0 : i32
    %c0_i32_0 = arith.constant 0 : i32
    %c0_i32_1 = arith.constant 0 : i32
    %c0_i32_2 = arith.constant 0 : i32
    return %c0_i32, %c0_i32_0, %c0_i32_1 : i32, i32, i32
  }
  func.func @transform_1(%arg0: i32) -> (i32, i32) {
    %c0_i32 = arith.constant 0 : i32
    %c0_i32_0 = arith.constant 0 : i32
    return %arg0, %c0_i32 : i32, i32
  }
  func.func @transform_2(%arg0: i32) -> (i32, i32) {
    %c0_i32 = arith.constant 0 : i32
    %c0_i32_0 = arith.constant 0 : i32
    %c0_i32_1 = arith.constant 0 : i32
    return %c0_i32, %c0_i32_0 : i32, i32
  }
  func.func @transform_3(%arg0: i32) -> (i32, i32) {
    %c0_i32 = arith.constant 0 : i32
    %c0_i32_0 = arith.constant 0 : i32
    %c0_i32_1 = arith.constant 0 : i32
    return %c0_i32, %c0_i32_0 : i32, i32
  }
  func.func @transform_4(%arg0: i32) -> (i32, i32) {
    %c0_i32 = arith.constant 0 : i32
    %c0_i32_0 = arith.constant 0 : i32
    %c0_i32_1 = arith.constant 0 : i32
    return %c0_i32, %c0_i32_0 : i32, i32
  }
  func.func @transform_5(%arg0: i32) -> (i32, i32) {
    %c0_i32 = arith.constant 0 : i32
    %c0_i32_0 = arith.constant 0 : i32
    %c0_i32_1 = arith.constant 0 : i32
    return %c0_i32, %c0_i32_0 : i32, i32
  }
}

</mosaic_0001>

<bundles_post_ra>
// kernel: tpu_custom_call.1
= control target key start
LH: loop header
LB: loop body
LE: loop exit
PB: predicated region body
PF: predicated region fallthrough
CT: control target
= control target key end

     0   :  { %10 = vsyncpa [#allocation4], 0  ;;  %s3348_s0 = inlined_call_operand.vmem [shape: bf16[1,2,3072], index: 0, kind: input, shape index: {}]   ;;  %s3349_s1 = inlined_call_operand.hbm [shape: bf16[3072,128], index: 1, kind: input, shape index: {}]   ;;  %s3350_s2 = inlined_call_operand.vmem [shape: f32[1,128], index: 2, kind: input, shape index: {}]   ;;  %s3351_s3 = inlined_call_operand.vmem [shape: bf16[128,8], index: 3, kind: input, shape index: {}]   ;;  %s3352_s4 = inlined_call_operand.vmem [shape: f32[1,8], index: 4, kind: input, shape index: {}]   ;;  %s3353_s5 = inlined_call_operand.hbm [shape: f32[2,8], index: 5, kind: output, shape index: {}]  }
   0x1   :  { %11 = vsyncpa [#allocation5], 0  ;;  %s3212_s18 = smov [#allocation3]   ;;  %s3164_s22 = scalar_lea.hbm %s3349_s1, 24576 }
   0x2   :  { %s19_s19 = sshll.u32 %s3212_s18, 4  ;;  %p3165_p0 = scmp.ne.s32.totalorder %s3349_s1, %s3164_s22  ;;  %s20_s19 = int_to_ptr.vmem [resolvable:$true] %s19_s19 }
   0x3   :  { %p3168_p1 = scmp.lt.u32.totalorder %s3164_s22, %s3349_s1 }
   0x5   :  { %p3170_p2 = pnand %p3168_p1, %p3165_p0 }
   0x7   :  { %3173 = shalt.err (!%p3170_p2)
}
   0x8   :  { %s3174_s27 = scalar_lea.vmem %s20_s19, 24576  ;;  %p3179_p4 = scmp.lt.s32.totalorder %s20_s19, %s20_s19 }
   0x9   :  { %p3175_p3 = scmp.ne.s32.totalorder %s20_s19, %s3174_s27  ;;  %p3180_p5 = scmp.lt.s32.totalorder %s3174_s27, %s3174_s27 }
   0xb   :  { %p3181_p6 = por %p3180_p5, %p3179_p4 }
   0xd   :  { %p3182_p7 = pnand %p3181_p6, %p3175_p3 }
   0xf   :  { %3185 = shalt.err (!%p3182_p7)
}
  0x10   :  { %s3213_s28 = smov 64   ;;  %s3214_s29 = smov 4  }
  0x11   :  { %25 = dma.hbm_to_vmem [thread:$0]  %s3349_s1, 24576, %s20_s19, [#allocation4], %s3213_s28, %s3213_s28, %s3214_s29  }
  0x12   :  { %3208 = dma.done.wait [#allocation4], 24576  }
  0x13   :  { %3209 = vsyncadd [#allocation4], 4294942720  ;;  %v2965_v0 = vld [vmem:[#allocation3 + $0x40] sm:$0xff]   ;;  %v2969_v4 = vld [vmem:[#allocation3 + $0x48] sm:$0xff]   ;;  %v3215_v22 = vmov 1966171168   ;;  %v438_v24 = vlaneseq }
  0x14   :  { %v2966_v1 = vld [vmem:[#allocation3 + $0xc0] sm:$0xff]   ;;  %2617 = vmatprep.subr.bf16.mxu0 %v2965_v0  ;;  %v2970_v5 = vld [vmem:[#allocation3 + $0xc8] sm:$0xff]   ;;  %v2973_v8 = vld [vmem:[#allocation3 + $0x50] sm:$0xff]   ;;  %v436_v23 = vunpack.c.l.s4 %v3215_v22  ;;  %vm3218_vm0 = vmmov 0   ;;  %s3219_s30 = smov [#allocation6]   ;;  %vm2367_vm1 = vcmask 58368  }
  0x15   :  { %v2967_v2 = vld [vmem:[#allocation3] sm:$0xff]   ;;  %2639 = vmatprep.subr.bf16.mxu1 %v2966_v1  ;;  %v2971_v6 = vld [vmem:[#allocation3 + $0x8] sm:$0xff]   ;;  %v2974_v9 = vld [vmem:[#allocation3 + $0xd0] sm:$0xff]   ;;  %v439_v30 = vshrl.u32 %v438_v24, 7  ;;  %s2375_s6 = sshll.u32 %s3219_s30, 4  ;;  %s2376_s6 = int_to_ptr.vmem [resolvable:$true] %s2375_s6 }
  0x16   :  { %v2968_v3 = vld [vmem:[#allocation3 + $0x80] sm:$0xff]   ;;  %2618 = vmatpush3.bf16.msra.mxu0 %v2967_v2  ;;  %v2972_v7 = vld [vmem:[#allocation3 + $0x88] sm:$0xff]   ;;  %v2975_v10 = vld [vmem:[#allocation3 + $0x10] sm:$0xff]   ;;  %v437_v29 = vunpack.c.0.s8 %v436_v23  ;;  %p3191_p9 = scmp.lt.s32.totalorder %s2376_s6, %s2376_s6 }
  0x17   :  { %2640 = vmatpush3.bf16.msra.mxu1 %v2968_v3  ;;  %2619 = vmatprep.subr.bf16.mxu0 %v2969_v4  ;;  %v2976_v11 = vld [vmem:[#allocation3 + $0x90] sm:$0xff]   ;;  %v2977_v12 = vld [vmem:[#allocation3 + $0x58] sm:$0xff]   ;;  %v2981_v16 = vld [vmem:[#allocation3 + $0x60] sm:$0xff]  }
  0x18   :  { %2641 = vmatprep.subr.bf16.mxu1 %v2970_v5  ;;  %v2978_v13 = vld [vmem:[#allocation3 + $0xd8] sm:$0xff]   ;;  %v2982_v17 = vld [vmem:[#allocation3 + $0xe0] sm:$0xff]   ;;  %v2985_v20 = vld [vmem:[#allocation3 + $0x68] sm:$0xff]   ;;  %v3262_v35 = vsub.s32 %v437_v29, %v439_v30 }
  0x19   :  { %v2979_v14 = vld [vmem:[#allocation3 + $0x18] sm:$0xff]   ;;  %v2983_v18 = vld [vmem:[#allocation3 + $0x20] sm:$0xff]   ;;  %v2986_v21 = vld [vmem:[#allocation3 + $0xe8] sm:$0xff]  }
  0x1a   :  { %2620 = vmatpush3.bf16.msra.mxu0 %v2971_v6  ;;  %v2980_v15 = vld [vmem:[#allocation3 + $0x98] sm:$0xff]   ;;  %v2984_v19 = vld [vmem:[#allocation3 + $0xa0] sm:$0xff]   ;;  %v2987_v25 = vld [vmem:[#allocation3 + $0x28] sm:$0xff]  }
  0x1b   :  { %2642 = vmatpush3.bf16.msra.mxu1 %v2972_v7  ;;  %2621 = vmatprep.subr.bf16.mxu0 %v2973_v8  ;;  %v2988_v26 = vld [vmem:[#allocation3 + $0xa8] sm:$0xff]   ;;  %v2989_v27 = vld [vmem:[#allocation3 + $0x70] sm:$0xff]   ;;  %v2993_v33 = vld [vmem:[#allocation3 + $0x78] sm:$0xff]  }
  0x1c   :  { %2643 = vmatprep.subr.bf16.mxu1 %v2974_v9  ;;  %v2990_v28 = vld [vmem:[#allocation3 + $0xf0] sm:$0xff]   ;;  %v2994_v34 = vld [vmem:[#allocation3 + $0xf8] sm:$0xff]   ;;  %v2998_v41 = vld [vmem:[#allocation3 + $0x140] sm:$0xff]  }
  0x1d   :  { %v2991_v31 = vld [vmem:[#allocation3 + $0x30] sm:$0xff]   ;;  %v2995_v36 = vld [vmem:[#allocation3 + $0x38] sm:$0xff]   ;;  %v2999_v42 = vld [vmem:[#allocation3 + $0x1c0] sm:$0xff]  }
  0x1e   :  { %2622 = vmatpush3.bf16.msra.mxu0 %v2975_v10  ;;  %v2992_v32 = vld [vmem:[#allocation3 + $0xb0] sm:$0xff]   ;;  %v2996_v37 = vld [vmem:[#allocation3 + $0xb8] sm:$0xff]   ;;  %v3000_v47 = vld [vmem:[#allocation3 + $0x100] sm:$0xff]  }
  0x1f   :  { %2644 = vmatpush3.bf16.msra.mxu1 %v2976_v11  ;;  %2623 = vmatprep.subr.bf16.mxu0 %v2977_v12  ;;  %v44_v38 = vld [vmem:[%s3348_s0] sm:$0xff]  ;;  %v3002_v50 = vld [vmem:[#allocation3 + $0x148] sm:$0xff]   ;;  %v3006_v57 = vld [vmem:[#allocation3 + $0x150] sm:$0xff]  }
  0x20   :  { %2645 = vmatprep.subr.bf16.mxu1 %v2978_v13  ;;  %v434_v39 = vcombine.high %v44_v38, %v44_v38  ;;  %v441_v40 = vrot.slane %v44_v38, %v3262_v35  ;;  %v3001_v52 = vld [vmem:[#allocation3 + $0x180] sm:$0xff]   ;;  %v3003_v54 = vld [vmem:[#allocation3 + $0x1c8] sm:$0xff]   ;;  %v3007_v59 = vld [vmem:[#allocation3 + $0x1d0] sm:$0xff]  }
  0x21   :  { %v3004_v55 = vld [vmem:[#allocation3 + $0x108] sm:$0xff]   ;;  %v3008_v60 = vld [vmem:[#allocation3 + $0x110] sm:$0xff]   ;;  %v3010_v61 = vld [vmem:[#allocation3 + $0x158] sm:$0xff]  }
  0x22   :  { %2624 = vmatpush3.bf16.msra.mxu0 %v2979_v14  ;;  %v449_v43 = vcombine.high %v441_v40, %v441_v40  ;;  %v457_v44 = vrot.slane %v441_v40, %v3262_v35  ;;  %v3270_v45 = vrot.slane %v434_v39, %v3262_v35  ;;  %v3005_v58 = vld [vmem:[#allocation3 + $0x188] sm:$0xff]   ;;  %v3009_v62 = vld [vmem:[#allocation3 + $0x190] sm:$0xff]   ;;  %v3011_v63 = vld [vmem:[#allocation3 + $0x1d8] sm:$0xff]  }
  0x23   :  { %2646 = vmatpush3.bf16.msra.mxu1 %v2980_v15  ;;  %2625 = vmatprep.subr.bf16.mxu0 %v2981_v16  ;;  %v3012_v0 = vld [vmem:[#allocation3 + $0x118] sm:$0xff]   ;;  %v3014_v1 = vld [vmem:[#allocation3 + $0x160] sm:$0xff]   ;;  %v3018_v5 = vld [vmem:[#allocation3 + $0x168] sm:$0xff]  }
  0x24   :  { %2647 = vmatprep.subr.bf16.mxu1 %v2982_v17  ;;  %v471_v46 = vrot.slane %v449_v43, %v3262_v35  ;;  %v450_v48 = vcombine.high %v3270_v45, %v3270_v45  ;;  %v479_v49 = vcombine.high %v457_v44, %v457_v44  ;;  %v3013_v2 = vld [vmem:[#allocation3 + $0x198] sm:$0xff]   ;;  %v3015_v3 = vld [vmem:[#allocation3 + $0x1e0] sm:$0xff]   ;;  %v3019_v7 = vld [vmem:[#allocation3 + $0x1e8] sm:$0xff]   ;;  %v464_v17 = vrot.slane %v3270_v45, %v3262_v35 }
  0x25   :  { %v3016_v4 = vld [vmem:[#allocation3 + $0x120] sm:$0xff]   ;;  %v3020_v8 = vld [vmem:[#allocation3 + $0x128] sm:$0xff]   ;;  %v3022_v9 = vld [vmem:[#allocation3 + $0x170] sm:$0xff]  }
  0x26   :  { %2626 = vmatpush3.bf16.msra.mxu0 %v2983_v18  ;;  %1789 = vmatprep.mubr.bf16.mxu0 %v471_v46  ;;  %v481_v51 = vcombine.high %v471_v46, %v471_v46  ;;  %v478_v53 = vrot.slane %v450_v48, %v3262_v35  ;;  %v3017_v6 = vld [vmem:[#allocation3 + $0x1a0] sm:$0xff]   ;;  %v3021_v10 = vld [vmem:[#allocation3 + $0x1a8] sm:$0xff]   ;;  %v3023_v11 = vld [vmem:[#allocation3 + $0x1f0] sm:$0xff]   ;;  %v480_v22 = vcombine.high %v464_v17, %v464_v17 }
  0x27   :  { %2648 = vmatpush3.bf16.msra.mxu1 %v2984_v19  ;;  %2627 = vmatprep.subr.bf16.mxu0 %v2985_v20  ;;  %v3024_v12 = vld [vmem:[#allocation3 + $0x130] sm:$0xff]   ;;  %v3026_v13 = vld [vmem:[#allocation3 + $0x178] sm:$0xff]   ;;  %v3030_v18 = vld [vmem:[#allocation3 + $0x240] sm:$0xff]  }
  0x28   :  { %2649 = vmatprep.subr.bf16.mxu1 %v2986_v21  ;;  %1829 = vmatprep.mubr.bf16.mxu1 %v481_v51  ;;  %v482_v56 = vcombine.high %v478_v53, %v478_v53  ;;  %v3025_v14 = vld [vmem:[#allocation3 + $0x1b0] sm:$0xff]   ;;  %v3027_v15 = vld [vmem:[#allocation3 + $0x1f8] sm:$0xff]   ;;  %v3031_v20 = vld [vmem:[#allocation3 + $0x2c0] sm:$0xff]  }
  0x29   :  { %v3028_v16 = vld [vmem:[#allocation3 + $0x138] sm:$0xff]   ;;  %v3032_v21 = vld [vmem:[#allocation3 + $0x200] sm:$0xff]   ;;  %v3034_v23 = vld [vmem:[#allocation3 + $0x248] sm:$0xff]  }
  0x2a   :  { %2628 = vmatpush3.bf16.msra.mxu0 %v2987_v25  ;;  %v3029_v19 = vld [vmem:[#allocation3 + $0x1b8] sm:$0xff]   ;;  %v3033_v24 = vld [vmem:[#allocation3 + $0x280] sm:$0xff]   ;;  %v3035_v25 = vld [vmem:[#allocation3 + $0x2c8] sm:$0xff]  }
  0x2b   :  { %2650 = vmatpush3.bf16.msra.mxu1 %v2988_v26  ;;  %2629 = vmatprep.subr.bf16.mxu0 %v2989_v27  ;;  %v3036_v26 = vld [vmem:[#allocation3 + $0x208] sm:$0xff]   ;;  %v3038_v27 = vld [vmem:[#allocation3 + $0x250] sm:$0xff]   ;;  %v3047_v38 = vld [vmem:[#allocation3 + $0x2e0] sm:$0xff]  }
  0x2c   :  { %2651 = vmatprep.subr.bf16.mxu1 %v2990_v28  ;;  %v3037_v28 = vld [vmem:[#allocation3 + $0x288] sm:$0xff]   ;;  %v3039_v29 = vld [vmem:[#allocation3 + $0x2d0] sm:$0xff]   ;;  %v3048_v39 = vld [vmem:[#allocation3 + $0x220] sm:$0xff]  }
  0x2d   :  { %v3040_v30 = vld [vmem:[#allocation3 + $0x210] sm:$0xff]   ;;  %v3050_v40 = vld [vmem:[#allocation3 + $0x268] sm:$0xff]   ;;  %v3058_v48 = vld [vmem:[#allocation3 + $0x278] sm:$0xff]  }
  0x2e   :  { %2630 = vmatpush3.bf16.msra.mxu0 %v2991_v31  ;;  %v3042_v31 = vld [vmem:[#allocation3 + $0x258] sm:$0xff]   ;;  %v3052_v43 = vld [vmem:[#allocation3 + $0x228] sm:$0xff]   ;;  %v3055_v46 = vld [vmem:[#allocation3 + $0x2f0] sm:$0xff]  }
  0x2f   :  { %2652 = vmatpush3.bf16.msra.mxu1 %v2992_v32  ;;  %2631 = vmatprep.subr.bf16.mxu0 %v2993_v33  ;;  %v3041_v32 = vld [vmem:[#allocation3 + $0x290] sm:$0xff]   ;;  %v3043_v33 = vld [vmem:[#allocation3 + $0x2d8] sm:$0xff]   ;;  %v3053_v45 = vld [vmem:[#allocation3 + $0x2a8] sm:$0xff]  }
  0x30   :  { %2653 = vmatprep.subr.bf16.mxu1 %v2994_v34  ;;  %v3044_v34 = vld [vmem:[#allocation3 + $0x218] sm:$0xff]   ;;  %v45_v51 = vld [vmem:[%s3348_s0 + $0x8] sm:$0xff] }
  0x32   :  { %2632 = vmatpush3.bf16.msra.mxu0 %v2995_v36  ;;  %v3046_v36 = vld [vmem:[#allocation3 + $0x260] sm:$0xff]  }
  0x33   :  { %2654 = vmatpush3.bf16.msra.mxu1 %v2996_v37  ;;  %2661 = vmatprep.subr.bf16.mxu0 %v2998_v41  ;;  %v3045_v37 = vld [vmem:[#allocation3 + $0x298] sm:$0xff]   ;;  %v3049_v41 = vld [vmem:[#allocation3 + $0x2a0] sm:$0xff]  }
  0x34   :  { %2683 = vmatprep.subr.bf16.mxu1 %v2999_v42  ;;  %v3051_v42 = vld [vmem:[#allocation3 + $0x2e8] sm:$0xff]  }
  0x35   :  { %1790 = vmatmul.mubr.bf16.vlgmr.msra.gmra.mrb[0].mxu0 %v457_v44  ;;  %v3054_v44 = vld [vmem:[#allocation3 + $0x270] sm:$0xff]  }
  0x36   :  { %2662 = vmatpush3.bf16.msra.mxu0 %v3000_v47  ;;  %1830 = vmatmul.mubr.bf16.vlgmr.msra.gmra.mrb[0].mxu1 %v479_v49  ;;  %v3056_v47 = vld [vmem:[#allocation3 + $0x230] sm:$0xff]  }
  0x37   :  { %2663 = vmatprep.subr.bf16.mxu0 %v3002_v50  ;;  %2684 = vmatpush3.bf16.msra.mxu1 %v3001_v52  ;;  %v3057_v49 = vld [vmem:[#allocation3 + $0x2b0] sm:$0xff]   ;;  %v3059_v50 = vld [vmem:[#allocation3 + $0x2f8] sm:$0xff]  }
  0x38   :  { %1869 = vmatprep.mubr.bf16.mxu0 %v478_v53  ;;  %2685 = vmatprep.subr.bf16.mxu1 %v3003_v54  ;;  %v3060_v52 = vld [vmem:[#allocation3 + $0x238] sm:$0xff]   ;;  %v490_v53 = vrot.slane %v45_v51, %v3262_v35  ;;  %v483_v54 = vcombine.high %v45_v51, %v45_v51  ;;  %v3111_v51 = vld [vmem:[#allocation3 + $0x460] sm:$0xff]  }
  0x39   :  { %1909 = vmatprep.mubr.bf16.mxu1 %v482_v56  ;;  %v3061_v56 = vld [vmem:[#allocation3 + $0x2b8] sm:$0xff]  }
  0x3a   :  { %2664 = vmatpush3.bf16.msra.mxu0 %v3004_v55  ;;  %v3062_v55 = vld [vmem:[#allocation3 + $0x340] sm:$0xff]  }
  0x3b   :  { %2665 = vmatprep.subr.bf16.mxu0 %v3006_v57  ;;  %2686 = vmatpush3.bf16.msra.mxu1 %v3005_v58  ;;  %v498_v57 = vcombine.high %v490_v53, %v490_v53  ;;  %v506_v58 = vrot.slane %v490_v53, %v3262_v35  ;;  %v3112_v53 = vld [vmem:[#allocation3 + $0x4e0] sm:$0xff]  }
  0x3c   :  { %2687 = vmatprep.subr.bf16.mxu1 %v3007_v59  ;;  %v3284_v59 = vrot.slane %v483_v54, %v3262_v35  ;;  %v3113_v54 = vld [vmem:[#allocation3 + $0x420] sm:$0xff]  }
  0x3e   :  { %2666 = vmatpush3.bf16.msra.mxu0 %v3008_v60  ;;  %v3063_v60 = vld [vmem:[#allocation3 + $0x3c0] sm:$0xff]  }
  0x3f   :  { %2667 = vmatprep.subr.bf16.mxu0 %v3010_v61  ;;  %2688 = vmatpush3.bf16.msra.mxu1 %v3009_v62  ;;  %v520_v61 = vrot.slane %v498_v57, %v3262_v35  ;;  %v3064_v62 = vld [vmem:[#allocation3 + $0x300] sm:$0xff]   ;;  %v3116_v57 = vld [vmem:[#allocation3 + $0x4e8] sm:$0xff]  }
  0x40   :  { %2689 = vmatprep.subr.bf16.mxu1 %v3011_v63  ;;  %v499_v63 = vcombine.high %v3284_v59, %v3284_v59 }
  0x42   :  { %2668 = vmatpush3.bf16.msra.mxu0 %v3012_v0  ;;  %v528_v0 = vcombine.high %v506_v58, %v506_v58 }
  0x43   :  { %2669 = vmatprep.subr.bf16.mxu0 %v3014_v1  ;;  %2690 = vmatpush3.bf16.msra.mxu1 %v3013_v2  ;;  %v3066_v1 = vld [vmem:[#allocation3 + $0x348] sm:$0xff]   ;;  %v530_v2 = vcombine.high %v520_v61, %v520_v61 }
  0x44   :  { %2691 = vmatprep.subr.bf16.mxu1 %v3015_v3  ;;  %v3065_v3 = vld [vmem:[#allocation3 + $0x380] sm:$0xff]  }
  0x46   :  { %2670 = vmatpush3.bf16.msra.mxu0 %v3016_v4  ;;  %v527_v4 = vrot.slane %v499_v63, %v3262_v35  ;;  %v3123_v63 = vld [vmem:[#allocation3 + $0x478] sm:$0xff]  }
  0x47   :  { %2671 = vmatprep.subr.bf16.mxu0 %v3018_v5  ;;  %2692 = vmatpush3.bf16.msra.mxu1 %v3017_v6  ;;  %v3067_v5 = vld [vmem:[#allocation3 + $0x3c8] sm:$0xff]  }
  0x48   :  { %2693 = vmatprep.subr.bf16.mxu1 %v3019_v7  ;;  %v3068_v6 = vld [vmem:[#allocation3 + $0x308] sm:$0xff]   ;;  %v531_v7 = vcombine.high %v527_v4, %v527_v4 }
  0x4a   :  { %2672 = vmatpush3.bf16.msra.mxu0 %v3020_v8  ;;  %v3070_v8 = vld [vmem:[#allocation3 + $0x350] sm:$0xff]  }
  0x4b   :  { %2673 = vmatprep.subr.bf16.mxu0 %v3022_v9  ;;  %2694 = vmatpush3.bf16.msra.mxu1 %v3021_v10  ;;  %v3069_v9 = vld [vmem:[#allocation3 + $0x388] sm:$0xff]   ;;  %v3071_v10 = vld [vmem:[#allocation3 + $0x3d0] sm:$0xff]  }
  0x4c   :  { %2695 = vmatprep.subr.bf16.mxu1 %v3023_v11  ;;  %v3072_v11 = vld [vmem:[#allocation3 + $0x310] sm:$0xff]  }
  0x4e   :  { %2674 = vmatpush3.bf16.msra.mxu0 %v3024_v12  ;;  %v3074_v12 = vld [vmem:[#allocation3 + $0x358] sm:$0xff]  }
  0x4f   :  { %2675 = vmatprep.subr.bf16.mxu0 %v3026_v13  ;;  %2696 = vmatpush3.bf16.msra.mxu1 %v3025_v14  ;;  %v3073_v13 = vld [vmem:[#allocation3 + $0x390] sm:$0xff]   ;;  %v3075_v14 = vld [vmem:[#allocation3 + $0x3d8] sm:$0xff]  }
  0x50   :  { %2697 = vmatprep.subr.bf16.mxu1 %v3027_v15  ;;  %v3076_v15 = vld [vmem:[#allocation3 + $0x318] sm:$0xff]  }
  0x52   :  { %2676 = vmatpush3.bf16.msra.mxu0 %v3028_v16  ;;  %v3078_v16 = vld [vmem:[#allocation3 + $0x360] sm:$0xff]  }
  0x53   :  { %2705 = vmatprep.subr.bf16.mxu0 %v3030_v18  ;;  %2698 = vmatpush3.bf16.msra.mxu1 %v3029_v19  ;;  %v3079_v18 = vld [vmem:[#allocation3 + $0x3e0] sm:$0xff]  }
  0x54   :  { %2727 = vmatprep.subr.bf16.mxu1 %v3031_v20  ;;  %v3080_v19 = vld [vmem:[#allocation3 + $0x320] sm:$0xff]   ;;  %v3082_v20 = vld [vmem:[#allocation3 + $0x368] sm:$0xff]  }
  0x55   :  { %1870 = vmatmul.mubr.bf16.vlgmr.msra.gmra.mrb[4].mxu0 %v464_v17  ;;  %v3077_v17 = vld [vmem:[#allocation3 + $0x398] sm:$0xff]  }
  0x56   :  { %2706 = vmatpush3.bf16.msra.mxu0 %v3032_v21  ;;  %1910 = vmatmul.mubr.bf16.vlgmr.msra.gmra.mrb[4].mxu1 %v480_v22  ;;  %v3081_v21 = vld [vmem:[#allocation3 + $0x3a0] sm:$0xff]   ;;  %v3083_v22 = vld [vmem:[#allocation3 + $0x3e8] sm:$0xff]  }
  0x57   :  { %2707 = vmatprep.subr.bf16.mxu0 %v3034_v23  ;;  %2728 = vmatpush3.bf16.msra.mxu1 %v3033_v24  ;;  %v3084_v23 = vld [vmem:[#allocation3 + $0x328] sm:$0xff]   ;;  %v3086_v24 = vld [vmem:[#allocation3 + $0x370] sm:$0xff]  }
  0x58   :  { %2729 = vmatprep.subr.bf16.mxu1 %v3035_v25  ;;  %1949 = vmatprep.mubr.bf16.mxu0 %v520_v61  ;;  %v3085_v25 = vld [vmem:[#allocation3 + $0x3a8] sm:$0xff]   ;;  %v3120_v61 = vld [vmem:[#allocation3 + $0x4f0] sm:$0xff]  }
  0x59   :  { %1989 = vmatprep.mubr.bf16.mxu1 %v530_v2  ;;  %v46_v2 = vld [vmem:[%s3348_s0 + $0x10] sm:$0xff] }
  0x5a   :  { %2708 = vmatpush3.bf16.msra.mxu0 %v3036_v26  ;;  %v3087_v26 = vld [vmem:[#allocation3 + $0x3f0] sm:$0xff]  }
  0x5b   :  { %2709 = vmatprep.subr.bf16.mxu0 %v3038_v27  ;;  %2730 = vmatpush3.bf16.msra.mxu1 %v3037_v28  ;;  %v3088_v27 = vld [vmem:[#allocation3 + $0x330] sm:$0xff]   ;;  %v3090_v28 = vld [vmem:[#allocation3 + $0x378] sm:$0xff]  }
  0x5c   :  { %2731 = vmatprep.subr.bf16.mxu1 %v3039_v29  ;;  %v3089_v29 = vld [vmem:[#allocation3 + $0x3b0] sm:$0xff]  }
  0x5e   :  { %2710 = vmatpush3.bf16.msra.mxu0 %v3040_v30  ;;  %v3091_v30 = vld [vmem:[#allocation3 + $0x3f8] sm:$0xff]  }
  0x5f   :  { %2711 = vmatprep.subr.bf16.mxu0 %v3042_v31  ;;  %2732 = vmatpush3.bf16.msra.mxu1 %v3041_v32  ;;  %v3092_v31 = vld [vmem:[#allocation3 + $0x338] sm:$0xff]   ;;  %v513_v32 = vrot.slane %v3284_v59, %v3262_v35  ;;  %v3119_v59 = vld [vmem:[#allocation3 + $0x470] sm:$0xff]  }
  0x60   :  { %2733 = vmatprep.subr.bf16.mxu1 %v3043_v33  ;;  %v3095_v33 = vld [vmem:[#allocation3 + $0x440] sm:$0xff]  }
  0x62   :  { %2712 = vmatpush3.bf16.msra.mxu0 %v3044_v34  ;;  %v3093_v34 = vld [vmem:[#allocation3 + $0x3b8] sm:$0xff]  }
  0x63   :  { %2713 = vmatprep.subr.bf16.mxu0 %v3046_v36  ;;  %2734 = vmatpush3.bf16.msra.mxu1 %v3045_v37  ;;  %v3096_v36 = vld [vmem:[#allocation3 + $0x4c0] sm:$0xff]  }
  0x64   :  { %2735 = vmatprep.subr.bf16.mxu1 %v3047_v38  ;;  %v3097_v37 = vld [vmem:[#allocation3 + $0x400] sm:$0xff]   ;;  %v529_v38 = vcombine.high %v513_v32, %v513_v32 }
  0x66   :  { %2714 = vmatpush3.bf16.msra.mxu0 %v3048_v39  ;;  %v3099_v39 = vld [vmem:[#allocation3 + $0x448] sm:$0xff]  }
  0x67   :  { %2715 = vmatprep.subr.bf16.mxu0 %v3050_v40  ;;  %2736 = vmatpush3.bf16.msra.mxu1 %v3049_v41  ;;  %v3098_v40 = vld [vmem:[#allocation3 + $0x480] sm:$0xff]   ;;  %v3100_v41 = vld [vmem:[#allocation3 + $0x4c8] sm:$0xff]  }
  0x68   :  { %2737 = vmatprep.subr.bf16.mxu1 %v3051_v42  ;;  %v3101_v42 = vld [vmem:[#allocation3 + $0x408] sm:$0xff]  }
  0x6a   :  { %2716 = vmatpush3.bf16.msra.mxu0 %v3052_v43  ;;  %v3103_v43 = vld [vmem:[#allocation3 + $0x450] sm:$0xff]  }
  0x6b   :  { %2717 = vmatprep.subr.bf16.mxu0 %v3054_v44  ;;  %2738 = vmatpush3.bf16.msra.mxu1 %v3053_v45  ;;  %v3102_v44 = vld [vmem:[#allocation3 + $0x488] sm:$0xff]   ;;  %v3104_v45 = vld [vmem:[#allocation3 + $0x4d0] sm:$0xff]  }
  0x6c   :  { %2739 = vmatprep.subr.bf16.mxu1 %v3055_v46  ;;  %v3105_v46 = vld [vmem:[#allocation3 + $0x410] sm:$0xff]  }
  0x6e   :  { %2718 = vmatpush3.bf16.msra.mxu0 %v3056_v47  ;;  %v3107_v47 = vld [vmem:[#allocation3 + $0x458] sm:$0xff]  }
  0x6f   :  { %2719 = vmatprep.subr.bf16.mxu0 %v3058_v48  ;;  %2740 = vmatpush3.bf16.msra.mxu1 %v3057_v49  ;;  %v3106_v48 = vld [vmem:[#allocation3 + $0x490] sm:$0xff]   ;;  %v3108_v49 = vld [vmem:[#allocation3 + $0x4d8] sm:$0xff]  }
  0x70   :  { %2741 = vmatprep.subr.bf16.mxu1 %v3059_v50  ;;  %v3109_v50 = vld [vmem:[#allocation3 + $0x418] sm:$0xff]  }
  0x72   :  { %2720 = vmatpush3.bf16.msra.mxu0 %v3060_v52  ;;  %v3110_v52 = vld [vmem:[#allocation3 + $0x498] sm:$0xff]  }
  0x73   :  { %2749 = vmatprep.subr.bf16.mxu0 %v3062_v55  ;;  %2742 = vmatpush3.bf16.msra.mxu1 %v3061_v56  ;;  %v3115_v55 = vld [vmem:[#allocation3 + $0x468] sm:$0xff]   ;;  %v3114_v56 = vld [vmem:[#allocation3 + $0x4a0] sm:$0xff]  }
  0x74   :  { %2771 = vmatprep.subr.bf16.mxu1 %v3063_v60  ;;  %v3118_v60 = vld [vmem:[#allocation3 + $0x4a8] sm:$0xff]  }
  0x75   :  { %1950 = vmatmul.mubr.bf16.vlgmr.msra.gmra.mrb[8].mxu0 %v506_v58  ;;  %v3117_v58 = vld [vmem:[#allocation3 + $0x428] sm:$0xff]  }
  0x76   :  { %2750 = vmatpush3.bf16.msra.mxu0 %v3064_v62  ;;  %1990 = vmatmul.mubr.bf16.vlgmr.msra.gmra.mrb[8].mxu1 %v528_v0  ;;  %v3121_v62 = vld [vmem:[#allocation3 + $0x430] sm:$0xff]  }
  0x77   :  { %2751 = vmatprep.subr.bf16.mxu0 %v3066_v1  ;;  %2772 = vmatpush3.bf16.msra.mxu1 %v3065_v3  ;;  %v3122_v0 = vld [vmem:[#allocation3 + $0x4b0] sm:$0xff]   ;;  %v3124_v1 = vld [vmem:[#allocation3 + $0x4f8] sm:$0xff]  }
  0x78   :  { %2029 = vmatprep.mubr.bf16.mxu0 %v527_v4  ;;  %2773 = vmatprep.subr.bf16.mxu1 %v3067_v5  ;;  %v3125_v3 = vld [vmem:[#allocation3 + $0x438] sm:$0xff]   ;;  %v539_v4 = vrot.slane %v46_v2, %v3262_v35  ;;  %v532_v5 = vcombine.high %v46_v2, %v46_v2 }
  0x79   :  { %2069 = vmatprep.mubr.bf16.mxu1 %v531_v7  ;;  %v3126_v7 = vld [vmem:[#allocation3 + $0x4b8] sm:$0xff]  }
  0x7a   :  { %2752 = vmatpush3.bf16.msra.mxu0 %v3068_v6  ;;  %v3127_v6 = vld [vmem:[#allocation3 + $0x540] sm:$0xff]  }
  0x7b   :  { %2753 = vmatprep.subr.bf16.mxu0 %v3070_v8  ;;  %2774 = vmatpush3.bf16.msra.mxu1 %v3069_v9  ;;  %v547_v8 = vcombine.high %v539_v4, %v539_v4  ;;  %v555_v9 = vrot.slane %v539_v4, %v3262_v35 }
  0x7c   :  { %2775 = vmatprep.subr.bf16.mxu1 %v3071_v10  ;;  %v3298_v10 = vrot.slane %v532_v5, %v3262_v35 }
  0x7e   :  { %2754 = vmatpush3.bf16.msra.mxu0 %v3072_v11  ;;  %v3128_v11 = vld [vmem:[#allocation3 + $0x5c0] sm:$0xff]  }
  0x7f   :  { %2755 = vmatprep.subr.bf16.mxu0 %v3074_v12  ;;  %2776 = vmatpush3.bf16.msra.mxu1 %v3073_v13  ;;  %v569_v12 = vrot.slane %v547_v8, %v3262_v35  ;;  %v3129_v13 = vld [vmem:[#allocation3 + $0x500] sm:$0xff]  }
  0x80   :  { %2777 = vmatprep.subr.bf16.mxu1 %v3075_v14  ;;  %v548_v14 = vcombine.high %v3298_v10, %v3298_v10 }
  0x82   :  { %2756 = vmatpush3.bf16.msra.mxu0 %v3076_v15  ;;  %v577_v15 = vcombine.high %v555_v9, %v555_v9 }
  0x83   :  { %2757 = vmatprep.subr.bf16.mxu0 %v3078_v16  ;;  %2778 = vmatpush3.bf16.msra.mxu1 %v3077_v17  ;;  %v3131_v16 = vld [vmem:[#allocation3 + $0x548] sm:$0xff]   ;;  %v579_v17 = vcombine.high %v569_v12, %v569_v12 }
  0x84   :  { %2779 = vmatprep.subr.bf16.mxu1 %v3079_v18  ;;  %v3130_v18 = vld [vmem:[#allocation3 + $0x580] sm:$0xff]  }
  0x86   :  { %2758 = vmatpush3.bf16.msra.mxu0 %v3080_v19  ;;  %v576_v19 = vrot.slane %v548_v14, %v3262_v35 }
  0x87   :  { %2759 = vmatprep.subr.bf16.mxu0 %v3082_v20  ;;  %2780 = vmatpush3.bf16.msra.mxu1 %v3081_v21  ;;  %v3132_v20 = vld [vmem:[#allocation3 + $0x5c8] sm:$0xff]  }
  0x88   :  { %2781 = vmatprep.subr.bf16.mxu1 %v3083_v22  ;;  %v3133_v21 = vld [vmem:[#allocation3 + $0x508] sm:$0xff]   ;;  %v580_v22 = vcombine.high %v576_v19, %v576_v19 }
  0x8a   :  { %2760 = vmatpush3.bf16.msra.mxu0 %v3084_v23  ;;  %v3135_v23 = vld [vmem:[#allocation3 + $0x550] sm:$0xff]  }
  0x8b   :  { %2761 = vmatprep.subr.bf16.mxu0 %v3086_v24  ;;  %2782 = vmatpush3.bf16.msra.mxu1 %v3085_v25  ;;  %v3134_v24 = vld [vmem:[#allocation3 + $0x588] sm:$0xff]   ;;  %v3136_v25 = vld [vmem:[#allocation3 + $0x5d0] sm:$0xff]  }
  0x8c   :  { %2783 = vmatprep.subr.bf16.mxu1 %v3087_v26  ;;  %v3137_v26 = vld [vmem:[#allocation3 + $0x510] sm:$0xff]  }
  0x8e   :  { %2762 = vmatpush3.bf16.msra.mxu0 %v3088_v27  ;;  %v3139_v27 = vld [vmem:[#allocation3 + $0x558] sm:$0xff]  }
  0x8f   :  { %2763 = vmatprep.subr.bf16.mxu0 %v3090_v28  ;;  %2784 = vmatpush3.bf16.msra.mxu1 %v3089_v29  ;;  %v3138_v28 = vld [vmem:[#allocation3 + $0x590] sm:$0xff]   ;;  %v3140_v29 = vld [vmem:[#allocation3 + $0x5d8] sm:$0xff]  }
  0x90   :  { %2785 = vmatprep.subr.bf16.mxu1 %v3091_v30  ;;  %v3141_v30 = vld [vmem:[#allocation3 + $0x518] sm:$0xff]  }
  0x92   :  { %2764 = vmatpush3.bf16.msra.mxu0 %v3092_v31  ;;  %v3143_v31 = vld [vmem:[#allocation3 + $0x560] sm:$0xff]  }
  0x93   :  { %2793 = vmatprep.subr.bf16.mxu0 %v3095_v33  ;;  %2786 = vmatpush3.bf16.msra.mxu1 %v3093_v34  ;;  %v3144_v33 = vld [vmem:[#allocation3 + $0x5e0] sm:$0xff]  }
  0x94   :  { %2815 = vmatprep.subr.bf16.mxu1 %v3096_v36  ;;  %v3145_v34 = vld [vmem:[#allocation3 + $0x520] sm:$0xff]   ;;  %v3147_v36 = vld [vmem:[#allocation3 + $0x568] sm:$0xff]  }
  0x95   :  { %2030 = vmatmul.mubr.bf16.vlgmr.msra.gmra.mrb[12].mxu0 %v513_v32  ;;  %v3142_v32 = vld [vmem:[#allocation3 + $0x598] sm:$0xff]  }
  0x96   :  { %2794 = vmatpush3.bf16.msra.mxu0 %v3097_v37  ;;  %2070 = vmatmul.mubr.bf16.vlgmr.msra.gmra.mrb[12].mxu1 %v529_v38  ;;  %v3146_v37 = vld [vmem:[#allocation3 + $0x5a0] sm:$0xff]   ;;  %v3148_v38 = vld [vmem:[#allocation3 + $0x5e8] sm:$0xff]  }
  0x97   :  { %2795 = vmatprep.subr.bf16.mxu0 %v3099_v39  ;;  %2816 = vmatpush3.bf16.msra.mxu1 %v3098_v40  ;;  %v3149_v39 = vld [vmem:[#allocation3 + $0x528] sm:$0xff]   ;;  %v3151_v40 = vld [vmem:[#allocation3 + $0x570] sm:$0xff]  }
  0x98   :  { %2817 = vmatprep.subr.bf16.mxu1 %v3100_v41  ;;  %2109 = vmatprep.mubr.bf16.mxu0 %v569_v12  ;;  %v3150_v41 = vld [vmem:[#allocation3 + $0x5a8] sm:$0xff]   ;;  %v2612_v12 = vld [vmem:[%s3351_s3 + $0x18] sm:$0xff]  }
  0x99   :  { %2149 = vmatprep.mubr.bf16.mxu1 %v579_v17  ;;  %v2615_v17 = vld [vmem:[%s3351_s3 + $0x30] sm:$0xff]  }
  0x9a   :  { %2796 = vmatpush3.bf16.msra.mxu0 %v3101_v42  ;;  %v3152_v42 = vld [vmem:[#allocation3 + $0x5f0] sm:$0xff]  }
  0x9b   :  { %2797 = vmatprep.subr.bf16.mxu0 %v3103_v43  ;;  %2818 = vmatpush3.bf16.msra.mxu1 %v3102_v44  ;;  %v3153_v43 = vld [vmem:[#allocation3 + $0x530] sm:$0xff]   ;;  %v3155_v44 = vld [vmem:[#allocation3 + $0x578] sm:$0xff]  }
  0x9c   :  { %2819 = vmatprep.subr.bf16.mxu1 %v3104_v45  ;;  %v3154_v45 = vld [vmem:[#allocation3 + $0x5b0] sm:$0xff]  }
  0x9e   :  { %2798 = vmatpush3.bf16.msra.mxu0 %v3105_v46  ;;  %v3156_v46 = vld [vmem:[#allocation3 + $0x5f8] sm:$0xff]  }
  0x9f   :  { %2799 = vmatprep.subr.bf16.mxu0 %v3107_v47  ;;  %2820 = vmatpush3.bf16.msra.mxu1 %v3106_v48  ;;  %v3157_v47 = vld [vmem:[#allocation3 + $0x538] sm:$0xff]   ;;  %v562_v48 = vrot.slane %v3298_v10, %v3262_v35 }
  0xa0   :  { %2821 = vmatprep.subr.bf16.mxu1 %v3108_v49  ;;  %v3158_v49 = vld [vmem:[#allocation3 + $0x5b8] sm:$0xff]  }
  0xa1   :  { %v2579_v35 = vld [vmem:[%s3351_s3] sm:$0xff]  }
  0xa2   :  { %2800 = vmatpush3.bf16.msra.mxu0 %v3109_v50  ;;  %v578_v50 = vcombine.high %v562_v48, %v562_v48 }
  0xa3   :  { %2801 = vmatprep.subr.bf16.mxu0 %v3111_v51  ;;  %2822 = vmatpush3.bf16.msra.mxu1 %v3110_v52 }
  0xa4   :  { %2823 = vmatprep.subr.bf16.mxu1 %v3112_v53 }
  0xa6   :  { %2802 = vmatpush3.bf16.msra.mxu0 %v3113_v54 }
  0xa7   :  { %2803 = vmatprep.subr.bf16.mxu0 %v3115_v55  ;;  %2824 = vmatpush3.bf16.msra.mxu1 %v3114_v56 }
  0xa8   :  { %2825 = vmatprep.subr.bf16.mxu1 %v3116_v57 }
  0xaa   :  { %2804 = vmatpush3.bf16.msra.mxu0 %v3117_v58 }
  0xab   :  { %2805 = vmatprep.subr.bf16.mxu0 %v3119_v59  ;;  %2826 = vmatpush3.bf16.msra.mxu1 %v3118_v60 }
  0xac   :  { %2827 = vmatprep.subr.bf16.mxu1 %v3120_v61 }
  0xae   :  { %2806 = vmatpush3.bf16.msra.mxu0 %v3121_v62  ;;  %v3216_v62 = vmov 0.0|0.0  }
  0xaf   :  { %2807 = vmatprep.subr.bf16.mxu0 %v3123_v63  ;;  %2828 = vmatpush3.bf16.msra.mxu1 %v3122_v0  ;;  %v2610_v63 = vld [vmem:[%s3351_s3 + $0x8] sm:$0xff]   ;;  %v2611_v0 = vld [vmem:[%s3351_s3 + $0x10] sm:$0xff]  }
  0xb0   :  { %2829 = vmatprep.subr.bf16.mxu1 %v3124_v1 }
  0xb2   :  { %2808 = vmatpush3.bf16.msra.mxu0 %v3125_v3 }
  0xb3   :  { %2837 = vmatprep.subr.bf16.mxu0 %v3127_v6  ;;  %2830 = vmatpush3.bf16.msra.mxu1 %v3126_v7  ;;  %v3217_v6 = vmov 0.0  }
  0xb4   :  { %2859 = vmatprep.subr.bf16.mxu1 %v3128_v11  ;;  %40 = vst [vmem:[#allocation2] sm:$0x3] %v3217_v6 }
  0xb5   :  { %2110 = vmatmul.mubr.bf16.vlgmr.msra.gmra.mrb[16].mxu0 %v555_v9 }
  0xb6   :  { %2838 = vmatpush3.bf16.msra.mxu0 %v3129_v13  ;;  %2150 = vmatmul.mubr.bf16.vlgmr.msra.gmra.mrb[16].mxu1 %v577_v15  ;;  %v2613_v15 = vld [vmem:[%s3351_s3 + $0x20] sm:$0xff]  }
  0xb7   :  { %2839 = vmatprep.subr.bf16.mxu0 %v3131_v16  ;;  %2860 = vmatpush3.bf16.msra.mxu1 %v3130_v18  ;;  %v2614_v16 = vld [vmem:[%s3351_s3 + $0x28] sm:$0xff]   ;;  %v2616_v18 = vld [vmem:[%s3351_s3 + $0x38] sm:$0xff]  }
  0xb8   :  { %2189 = vmatprep.mubr.bf16.mxu0 %v576_v19  ;;  %2861 = vmatprep.subr.bf16.mxu1 %v3132_v20 }
  0xb9   :  { %2229 = vmatprep.mubr.bf16.mxu1 %v580_v22 }
  0xba   :  { %2840 = vmatpush3.bf16.msra.mxu0 %v3133_v21 }
  0xbb   :  { %2841 = vmatprep.subr.bf16.mxu0 %v3135_v23  ;;  %2862 = vmatpush3.bf16.msra.mxu1 %v3134_v24 }
  0xbc   :  { %2863 = vmatprep.subr.bf16.mxu1 %v3136_v25 }
  0xbe   :  { %2842 = vmatpush3.bf16.msra.mxu0 %v3137_v26 }
  0xbf   :  { %2843 = vmatprep.subr.bf16.mxu0 %v3139_v27  ;;  %2864 = vmatpush3.bf16.msra.mxu1 %v3138_v28 }
  0xc0   :  { %2865 = vmatprep.subr.bf16.mxu1 %v3140_v29 }
  0xc2   :  { %2844 = vmatpush3.bf16.msra.mxu0 %v3141_v30 }
  0xc3   :  { %2845 = vmatprep.subr.bf16.mxu0 %v3143_v31  ;;  %2866 = vmatpush3.bf16.msra.mxu1 %v3142_v32 }
  0xc4   :  { %2867 = vmatprep.subr.bf16.mxu1 %v3144_v33 }
  0xc6   :  { %2846 = vmatpush3.bf16.msra.mxu0 %v3145_v34 }
  0xc7   :  { %2847 = vmatprep.subr.bf16.mxu0 %v3147_v36  ;;  %2868 = vmatpush3.bf16.msra.mxu1 %v3146_v37 }
  0xc8   :  { %2869 = vmatprep.subr.bf16.mxu1 %v3148_v38 }
  0xca   :  { %2848 = vmatpush3.bf16.msra.mxu0 %v3149_v39 }
  0xcb   :  { %2849 = vmatprep.subr.bf16.mxu0 %v3151_v40  ;;  %2870 = vmatpush3.bf16.msra.mxu1 %v3150_v41 }
  0xcc   :  { %2871 = vmatprep.subr.bf16.mxu1 %v3152_v42 }
  0xce   :  { %2850 = vmatpush3.bf16.msra.mxu0 %v3153_v43 }
  0xcf   :  { %2851 = vmatprep.subr.bf16.mxu0 %v3155_v44  ;;  %2872 = vmatpush3.bf16.msra.mxu1 %v3154_v45 }
  0xd0   :  { %2873 = vmatprep.subr.bf16.mxu1 %v3156_v46 }
  0xd2   :  { %2852 = vmatpush3.bf16.msra.mxu0 %v3157_v47 }
  0xd3   :  { %2874 = vmatpush3.bf16.msra.mxu1 %v3158_v49  ;;  %2933 = vmatprep.subr.bf16.mxu0 %v3216_v62 }
  0xd5   :  { %2190 = vmatmul.mubr.bf16.vlgmr.msra.gmra.mrb[20].mxu0 %v562_v48 }
  0xd6   :  { %2230 = vmatmul.mubr.bf16.vlgmr.msra.gmra.mrb[20].mxu1 %v578_v50  ;;  %2935 = vmatpush3.bf16.msra.mxu0 %v2579_v35 }
  0xd7   :  { %2936 = vmatprep.subr.bf16.mxu0 %v3216_v62  ;;  %2930 = vmatprep.mubr.msk.f32.mxu0 %vm3218_vm0, %v3217_v6 }
  0xda   :  { %2938 = vmatpush3.bf16.msra.mxu0 %v2610_v63 }
  0xdb   :  { %2939 = vmatprep.subr.bf16.mxu0 %v3216_v62 }
  0xde   :  { %2941 = vmatpush3.bf16.msra.mxu0 %v2611_v0 }
  0xdf   :  { %2942 = vmatprep.subr.bf16.mxu0 %v3216_v62 }
  0xe2   :  { %2944 = vmatpush3.bf16.msra.mxu0 %v2612_v12 }
  0xe3   :  { %2945 = vmatprep.subr.bf16.mxu0 %v3216_v62 }
  0xe6   :  { %2947 = vmatpush3.bf16.msra.mxu0 %v2613_v15 }
  0xe7   :  { %2948 = vmatprep.subr.bf16.mxu0 %v3216_v62 }
  0xea   :  { %2950 = vmatpush3.bf16.msra.mxu0 %v2614_v16 }
  0xeb   :  { %2951 = vmatprep.subr.bf16.mxu0 %v3216_v62 }
  0xee   :  { %2953 = vmatpush3.bf16.msra.mxu0 %v2615_v17 }
  0xef   :  { %2954 = vmatprep.subr.bf16.mxu0 %v3216_v62 }
  0xf2   :  { %2956 = vmatpush3.bf16.msra.mxu0 %v2616_v18 }
 0x108   :  { %v2633_v51 = vpop.f32.mrb[0].mxu0 }
 0x109   :  { %v2634_v52 = vpop.f32.mrb[1].mxu0  ;;  %v2655_v53 = vpop.f32.mrb[0].mxu1 }
 0x10a   :  { %v2635_v54 = vadd.f32 %v2634_v52, %v2633_v51  ;;  %v2636_v55 = vpop.f32.mrb[2].mxu0  ;;  %v2656_v56 = vpop.f32.mrb[1].mxu1 }
 0x10b   :  { %v2637_v57 = vpop.f32.mrb[3].mxu0  ;;  %v2657_v58 = vadd.f32 %v2656_v56, %v2655_v53  ;;  %v2658_v59 = vpop.f32.mrb[2].mxu1 }
 0x10c   :  { %v2659_v60 = vpop.f32.mrb[3].mxu1 }
 0x10d   :  { %v1832_v61 = vadd.f32 %v2657_v58, %v2635_v54 }
 0x128   :  { %v2677_v1 = vpop.f32.mrb[4].mxu0 }
 0x129   :  { %v2678_v2 = vpop.f32.mrb[5].mxu0  ;;  %v2699_v3 = vpop.f32.mrb[4].mxu1 }
 0x12a   :  { %v2679_v4 = vadd.f32 %v2678_v2, %v2677_v1  ;;  %v2680_v5 = vpop.f32.mrb[6].mxu0  ;;  %v2700_v7 = vpop.f32.mrb[5].mxu1  ;;  %v41_v2 = vld [vmem:[#allocation2] sm:$0x3] }
 0x12b   :  { %v2681_v8 = vpop.f32.mrb[7].mxu0  ;;  %v2701_v10 = vadd.f32 %v2700_v7, %v2699_v3  ;;  %v2702_v11 = vpop.f32.mrb[6].mxu1  ;;  %v2576_v5 = vld [vmem:[%s3350_s2] ss:$0 sm:$0xff]  ;;  %s3186_s2 = scalar_lea.vmem %s2376_s6, 32 }
 0x12c   :  { %v1872_v9 = vadd.f32 %v2679_v4, %v1832_v61  ;;  %v2703_v13 = vpop.f32.mrb[7].mxu1  ;;  %p3187_p8 = scmp.ne.s32.totalorder %s2376_s6, %s3186_s2  ;;  %p3192_p10 = scmp.lt.s32.totalorder %s3186_s2, %s3186_s2 }
 0x12e   :  { %v1912_v14 = vadd.f32 %v2701_v10, %v1872_v9  ;;  %v2577_v9 = vld [vmem:[%s3352_s4] ss:$0 sm:$0xff]  ;;  %p3193_p11 = por %p3192_p10, %p3191_p9 }
 0x130   :  { %p3194_p12 = pnand %p3193_p11, %p3187_p8 }
 0x148   :  { %v2721_v19 = vpop.f32.mrb[8].mxu0 }
 0x149   :  { %v2722_v20 = vpop.f32.mrb[9].mxu0  ;;  %v2743_v21 = vpop.f32.mrb[8].mxu1 }
 0x14a   :  { %v2723_v22 = vadd.f32 %v2722_v20, %v2721_v19  ;;  %v2724_v23 = vpop.f32.mrb[10].mxu0  ;;  %v2744_v24 = vpop.f32.mrb[9].mxu1 }
 0x14b   :  { %v2725_v25 = vpop.f32.mrb[11].mxu0  ;;  %v2745_v27 = vadd.f32 %v2744_v24, %v2743_v21  ;;  %v2746_v28 = vpop.f32.mrb[10].mxu1 }
 0x14c   :  { %v1952_v26 = vadd.f32 %v2723_v22, %v1912_v14  ;;  %v2747_v29 = vpop.f32.mrb[11].mxu1 }
 0x14e   :  { %v1992_v30 = vadd.f32 %v2745_v27, %v1952_v26 }
 0x168   :  { %v2765_v31 = vpop.f32.mrb[12].mxu0 }
 0x169   :  { %v2766_v32 = vpop.f32.mrb[13].mxu0  ;;  %v2787_v33 = vpop.f32.mrb[12].mxu1 }
 0x16a   :  { %v2767_v34 = vadd.f32 %v2766_v32, %v2765_v31  ;;  %v2768_v36 = vpop.f32.mrb[14].mxu0  ;;  %v2788_v37 = vpop.f32.mrb[13].mxu1 }
 0x16b   :  { %v2769_v38 = vpop.f32.mrb[15].mxu0  ;;  %v2789_v40 = vadd.f32 %v2788_v37, %v2787_v33  ;;  %v2790_v41 = vpop.f32.mrb[14].mxu1 }
 0x16c   :  { %v2032_v39 = vadd.f32 %v2767_v34, %v1992_v30  ;;  %v2791_v42 = vpop.f32.mrb[15].mxu1 }
 0x16e   :  { %v2072_v43 = vadd.f32 %v2789_v40, %v2032_v39 }
 0x188   :  { %v2809_v44 = vpop.f32.mrb[16].mxu0 }
 0x189   :  { %v2810_v45 = vpop.f32.mrb[17].mxu0  ;;  %v2831_v46 = vpop.f32.mrb[16].mxu1 }
 0x18a   :  { %v2811_v47 = vadd.f32 %v2810_v45, %v2809_v44  ;;  %v2812_v48 = vpop.f32.mrb[18].mxu0  ;;  %v2832_v49 = vpop.f32.mrb[17].mxu1 }
 0x18b   :  { %v2813_v50 = vpop.f32.mrb[19].mxu0  ;;  %v2833_v52 = vadd.f32 %v2832_v49, %v2831_v46  ;;  %v2834_v53 = vpop.f32.mrb[18].mxu1 }
 0x18c   :  { %v2112_v51 = vadd.f32 %v2811_v47, %v2072_v43  ;;  %v2835_v54 = vpop.f32.mrb[19].mxu1 }
 0x18e   :  { %v2152_v55 = vadd.f32 %v2833_v52, %v2112_v51 }
 0x1a8   :  { %v2853_v56 = vpop.f32.mrb[20].mxu0 }
 0x1a9   :  { %v2854_v57 = vpop.f32.mrb[21].mxu0  ;;  %v2875_v58 = vpop.f32.mrb[20].mxu1 }
 0x1aa   :  { %v2855_v59 = vadd.f32 %v2854_v57, %v2853_v56  ;;  %v2856_v60 = vpop.f32.mrb[22].mxu0  ;;  %v2876_v61 = vpop.f32.mrb[21].mxu1 }
 0x1ab   :  { %v2857_v35 = vpop.f32.mrb[23].mxu0  ;;  %v2877_v63 = vadd.f32 %v2876_v61, %v2875_v58  ;;  %v2878_v0 = vpop.f32.mrb[22].mxu1 }
 0x1ac   :  { %v2192_v62 = vadd.f32 %v2855_v59, %v2152_v55  ;;  %v2879_v1 = vpop.f32.mrb[23].mxu1 }
 0x1ae   :  { %v2232_v3 = vadd.f32 %v2877_v63, %v2192_v62 }
 0x1b0   :  { %v2237_v4 = vadd.f32 %v2232_v3, %v41_v2 }
 0x1b2   :  { %2238 = vst [vmem:[#allocation2] sm:$0x3] %v2237_v4 }
 0x1b9   :  { %v2242_v6 = vld [vmem:[#allocation2] sm:$0x3] }
 0x1ba   :  { %v2250_v7 = vadd.f32 %v2576_v5, %v2242_v6 }
 0x1bc   :  { %v2251_v8 = vmax.f32 %v2250_v7, 0.0 }
 0x1be   :  { %2931 = vmatmul.mubr.f32.vlgmr.msra.gmra.mrb[24].mxu0 %v2251_v8 }
 0x291   :  { %v2357_v10 = vpop.f32.mrb[24].mxu0 }
 0x292   :  { %v2358_v11 = vadd.f32 %v2577_v9, %v2357_v10  ;;  %v2932_v12 = vpop.f32.mrb[25].mxu0 }
 0x294   :  { %v2361_v13 = vsub.f32 0.0, %v2358_v11 }
 0x296   :  { %v2362_v14 = vmul.f32 1.442695, %v2361_v13 }
 0x298   :  { %3160 = vpow2.f32 %v2362_v14 }
 0x2a2   :  { %v3161_v15 = vpop.eup %3160 }
 0x2a3   :  { %v2364_v16 = vadd.f32 1.0, %v3161_v15 }
 0x2a5   :  { %3162 = vrcp.f32 %v2364_v16 }
 0x2af   :  { %v3163_v17 = vpop.eup %3162 }
 0x2b0   :  { %2368 = vst.msk [vmem:[#allocation6] sm:$0x3] %vm2367_vm1, %v3163_v17 }
 0x2b1   :  { %3197 = shalt.err (!%p3194_p12)
}
 0x2b2   :  { %s3198_s7 = scalar_lea.hbm %s3353_s5, 32 }
 0x2b3   :  { %p3199_p13 = scmp.ne.s32.totalorder %s3353_s5, %s3198_s7  ;;  %p3202_p0 = scmp.lt.u32.totalorder %s3198_s7, %s3353_s5 }
 0x2b5   :  { %p3204_p1 = pnand %p3202_p0, %p3199_p13 }
 0x2b7   :  { %3207 = shalt.err (!%p3204_p1)
}
 0x2b8   :  { %2378 = dma.vmem_to_hbm [thread:$0]  %s2376_s6, 32, %s3353_s5, [#allocation5]  }
 0x2b9   :  { %3210 = dma.done.wait [#allocation5], 32  }
 0x2ba   :  { %3211 = vsyncadd [#allocation5], 4294967264 }
 0x2bb   :  { %2382 = vsyncpa [#allocation4], 1 }
 0x2bc   :  { %2383 = vsyncpa [#allocation5], 1 }

</bundles_post_ra>
